<compile_context>
chip_gen: v6e
topology: v6e:2x2x1
jax: 0.10.0
libtpu: 0.0.40
codegen_flags: <defaults>
</compile_context>

<pallas_src>
import functools

import jax
import jax.numpy as jnp
from jax.experimental import pallas as pl
from jax.experimental.pallas import tpu as pltpu

LANE = 128
SUBLANE = 8


def dqn_kernel(x_ref, w1_ref, b1_ref, w2_ref, b2_ref, w3_ref, b3_ref, o_ref):
    # Layer 1: Linear(state_size -> hidden) + ReLU
    h1 = jnp.dot(x_ref[...], w1_ref[...], preferred_element_type=jnp.float32)
    h1 = jnp.maximum(h1 + b1_ref[...], 0.0)
    # Layer 2: Linear(hidden -> hidden) + ReLU
    h2 = jnp.dot(h1, w2_ref[...], preferred_element_type=jnp.float32)
    h2 = jnp.maximum(h2 + b2_ref[...], 0.0)
    # Layer 3: Linear(hidden -> padded action dim), no activation.
    out = jnp.dot(h2, w3_ref[...], preferred_element_type=jnp.float32)
    o_ref[...] = (out + b3_ref[...]).astype(o_ref.dtype)


def _round_up(x, m):
    return ((x + m - 1) // m) * m


@jax.jit
def dqn_forward(state, w1, b1, w2, b2, w3, b3):
    """3-layer DQN forward; state is (B, state_size) float32."""
    B, state_size = state.shape
    hidden = w1.shape[1]
    action_size = w3.shape[1]

    # --- Lane-dense output: pad the action dimension up to a full 128 lanes.
    out_pad = _round_up(max(action_size, LANE), LANE)
    if out_pad != action_size:
        w3p = jnp.zeros((hidden, out_pad), w3.dtype).at[:, :action_size].set(w3)
        b3p = jnp.zeros((1, out_pad), b3.dtype).at[:, :action_size].set(b3)
    else:
        w3p, b3p = w3, b3

    # --- Batch tiling: TB rows per grid step (sublane-aligned), batch padded
    # to a multiple of TB. Extra rows are zeros and get sliced away below.
    TB = min(1024, _round_up(B, SUBLANE))
    B_pad = _round_up(B, TB)
    if B_pad != B:
        state = jnp.zeros((B_pad, state_size), state.dtype).at[:B].set(state)

    resident = lambda shape: pl.BlockSpec(shape, lambda i: (0, 0))

    out = pl.pallas_call(
        dqn_kernel,
        out_shape=jax.ShapeDtypeStruct((B_pad, out_pad), jnp.float32),
        grid=(B_pad // TB,),
        in_specs=[
            pl.BlockSpec((TB, state_size), lambda i: (i, 0)),  # streamed tile
            resident(w1.shape), resident(b1.shape),            # VMEM-resident
            resident(w2.shape), resident(b2.shape),
            resident(w3p.shape), resident(b3p.shape),
        ],
        out_specs=pl.BlockSpec((TB, out_pad), lambda i: (i, 0)),
        compiler_params=pltpu.CompilerParams(
            dimension_semantics=("parallel",)),
    )(state, w1, b1, w2, b2, w3p, b3p)

    return out[:B, :action_size]


def init_params(key, state_size=8, action_size=4, hidden_size=128):
    """Deterministic init mimicking nn.Linear's default U(-1/sqrt(fan_in), +)."""
    ks = jax.random.split(key, 6)

    def lin(kw, kb, fan_in, fan_out):
        bound = 1.0 / jnp.sqrt(fan_in)
        # stored as (in, out) so the kernel does x @ W
        w = jax.random.uniform(kw, (fan_in, fan_out), jnp.float32, -bound, bound)
        b = jax.random.uniform(kb, (1, fan_out), jnp.float32, -bound, bound)
        return w, b

    w1, b1 = lin(ks[0], ks[1], state_size, hidden_size)
    w2, b2 = lin(ks[2], ks[3], hidden_size, hidden_size)
    w3, b3 = lin(ks[4], ks[5], hidden_size, action_size)
    return w1, b1, w2, b2, w3, b3


if __name__ == "__main__":
    state_size, action_size, hidden_size = 8, 4, 128
    batch = 8  # small demo batch; kernel pads/tiles it internally

    key = jax.random.PRNGKey(0)
    k_params, k_state = jax.random.split(key)
    params = init_params(k_params, state_size, action_size, hidden_size)
    state = jax.random.normal(k_state, (batch, state_size), jnp.float32)

    q_values = dqn_forward(state, *params)
    q_values = jax.block_until_ready(q_values)

    # Pure-JAX reference check (same math, outside Pallas).
    w1, b1, w2, b2, w3, b3 = params
    ref = jnp.maximum(state @ w1 + b1, 0.0)
    ref = jnp.maximum(ref @ w2 + b2, 0.0)
    ref = ref @ w3 + b3
    assert q_values.shape == (batch, action_size)
    assert jnp.allclose(q_values, ref, atol=1e-5, rtol=1e-5)

    print("KERNEL_OK")
</pallas_src>

<mosaic_0001>
module attributes {stable_mosaic.version = 11 : i64} {
  func.func @dqn_kernel(%arg0: i32, %arg1: memref<8x8xf32, #tpu.memory_space<vmem>>, %arg2: memref<8x128xf32, #tpu.memory_space<vmem>>, %arg3: memref<1x128xf32, #tpu.memory_space<vmem>>, %arg4: memref<128x128xf32, #tpu.memory_space<vmem>>, %arg5: memref<1x128xf32, #tpu.memory_space<vmem>>, %arg6: memref<128x128xf32, #tpu.memory_space<vmem>>, %arg7: memref<1x128xf32, #tpu.memory_space<vmem>>, %arg8: memref<8x128xf32, #tpu.memory_space<vmem>>) attributes {dimension_semantics = [#tpu.dimension_semantics<parallel>], iteration_bounds = array<i64: 1>, scalar_prefetch = 0 : i64, scratch_operands = 0 : i64, tpu.core_type = #tpu.core_type<tc>, window_params = [{transform_indices = @transform_0, window_bounds = array<i64: 8, 8>}, {pipeline_mode = #tpu.pipeline_mode<synchronous>, transform_indices = @transform_1, window_bounds = array<i64: 8, 128>}, {pipeline_mode = #tpu.pipeline_mode<synchronous>, transform_indices = @transform_2, window_bounds = array<i64: 1, 128>}, {pipeline_mode = #tpu.pipeline_mode<synchronous>, transform_indices = @transform_3, window_bounds = array<i64: 128, 128>}, {pipeline_mode = #tpu.pipeline_mode<synchronous>, transform_indices = @transform_4, window_bounds = array<i64: 1, 128>}, {pipeline_mode = #tpu.pipeline_mode<synchronous>, transform_indices = @transform_5, window_bounds = array<i64: 128, 128>}, {pipeline_mode = #tpu.pipeline_mode<synchronous>, transform_indices = @transform_6, window_bounds = array<i64: 1, 128>}, {transform_indices = @transform_7, window_bounds = array<i64: 8, 128>}]} {
    %c0 = arith.constant 0 : index
    %c0_0 = arith.constant 0 : index
    %0 = vector.load %arg1[%c0, %c0_0] : memref<8x8xf32, #tpu.memory_space<vmem>>, vector<8x8xf32>
    %c0_1 = arith.constant 0 : index
    %c0_2 = arith.constant 0 : index
    %1 = vector.load %arg2[%c0_1, %c0_2] : memref<8x128xf32, #tpu.memory_space<vmem>>, vector<8x128xf32>
    %cst = arith.constant dense<0.000000e+00> : vector<8x128xf32>
    %2 = tpu.matmul %0, %1, %cst {dimension_numbers = #tpu.dot_dimension_numbers<[1], [0], [0], [1], [0, 0, 1, 1], [], []>} : vector<8x8xf32>, vector<8x128xf32>, vector<8x128xf32> -> vector<8x128xf32>
    %c0_3 = arith.constant 0 : index
    %c0_4 = arith.constant 0 : index
    %3 = vector.load %arg3[%c0_3, %c0_4] : memref<1x128xf32, #tpu.memory_space<vmem>>, vector<1x128xf32>
    %4 = vector.broadcast %3 : vector<1x128xf32> to vector<8x128xf32>
    %5 = arith.addf %2, %4 : vector<8x128xf32>
    %cst_5 = arith.constant 0.000000e+00 : f32
    %6 = vector.broadcast %cst_5 : f32 to vector<8x128xf32>
    %7 = arith.maximumf %5, %6 : vector<8x128xf32>
    %c0_6 = arith.constant 0 : index
    %c0_7 = arith.constant 0 : index
    %8 = vector.load %arg4[%c0_6, %c0_7] : memref<128x128xf32, #tpu.memory_space<vmem>>, vector<128x128xf32>
    %cst_8 = arith.constant dense<0.000000e+00> : vector<8x128xf32>
    %9 = tpu.matmul %7, %8, %cst_8 {dimension_numbers = #tpu.dot_dimension_numbers<[1], [0], [0], [1], [0, 0, 1, 1], [], []>} : vector<8x128xf32>, vector<128x128xf32>, vector<8x128xf32> -> vector<8x128xf32>
    %c0_9 = arith.constant 0 : index
    %c0_10 = arith.constant 0 : index
    %10 = vector.load %arg5[%c0_9, %c0_10] : memref<1x128xf32, #tpu.memory_space<vmem>>, vector<1x128xf32>
    %11 = vector.broadcast %10 : vector<1x128xf32> to vector<8x128xf32>
    %12 = arith.addf %9, %11 : vector<8x128xf32>
    %cst_11 = arith.constant 0.000000e+00 : f32
    %13 = vector.broadcast %cst_11 : f32 to vector<8x128xf32>
    %14 = arith.maximumf %12, %13 : vector<8x128xf32>
    %c0_12 = arith.constant 0 : index
    %c0_13 = arith.constant 0 : index
    %15 = vector.load %arg6[%c0_12, %c0_13] : memref<128x128xf32, #tpu.memory_space<vmem>>, vector<128x128xf32>
    %cst_14 = arith.constant dense<0.000000e+00> : vector<8x128xf32>
    %16 = tpu.matmul %14, %15, %cst_14 {dimension_numbers = #tpu.dot_dimension_numbers<[1], [0], [0], [1], [0, 0, 1, 1], [], []>} : vector<8x128xf32>, vector<128x128xf32>, vector<8x128xf32> -> vector<8x128xf32>
    %c0_15 = arith.constant 0 : index
    %c0_16 = arith.constant 0 : index
    %17 = vector.load %arg7[%c0_15, %c0_16] : memref<1x128xf32, #tpu.memory_space<vmem>>, vector<1x128xf32>
    %18 = vector.broadcast %17 : vector<1x128xf32> to vector<8x128xf32>
    %19 = arith.addf %16, %18 : vector<8x128xf32>
    %c0_17 = arith.constant 0 : index
    %c0_18 = arith.constant 0 : index
    %20 = vector.load %arg8[%c0_17, %c0_18] : memref<8x128xf32, #tpu.memory_space<vmem>>, vector<8x128xf32>
    tpu.vector_store %arg8[%c0_17, %c0_18], %19 {strides = array<i32>} : memref<8x128xf32, #tpu.memory_space<vmem>>, vector<8x128xf32>,
    return
  }
  func.func @transform_0(%arg0: i32) -> (i32, i32) {
    %c0_i32 = arith.constant 0 : i32
    %c0_i32_0 = arith.constant 0 : i32
    return %arg0, %c0_i32 : i32, i32
  }
  func.func @transform_1(%arg0: i32) -> (i32, i32) {
    %c0_i32 = arith.constant 0 : i32
    %c0_i32_0 = arith.constant 0 : i32
    %c0_i32_1 = arith.constant 0 : i32
    return %c0_i32, %c0_i32_0 : i32, i32
  }
  func.func @transform_2(%arg0: i32) -> (i32, i32) {
    %c0_i32 = arith.constant 0 : i32
    %c0_i32_0 = arith.constant 0 : i32
    %c0_i32_1 = arith.constant 0 : i32
    return %c0_i32, %c0_i32_0 : i32, i32
  }
  func.func @transform_3(%arg0: i32) -> (i32, i32) {
    %c0_i32 = arith.constant 0 : i32
    %c0_i32_0 = arith.constant 0 : i32
    %c0_i32_1 = arith.constant 0 : i32
    return %c0_i32, %c0_i32_0 : i32, i32
  }
  func.func @transform_4(%arg0: i32) -> (i32, i32) {
    %c0_i32 = arith.constant 0 : i32
    %c0_i32_0 = arith.constant 0 : i32
    %c0_i32_1 = arith.constant 0 : i32
    return %c0_i32, %c0_i32_0 : i32, i32
  }
  func.func @transform_5(%arg0: i32) -> (i32, i32) {
    %c0_i32 = arith.constant 0 : i32
    %c0_i32_0 = arith.constant 0 : i32
    %c0_i32_1 = arith.constant 0 : i32
    return %c0_i32, %c0_i32_0 : i32, i32
  }
  func.func @transform_6(%arg0: i32) -> (i32, i32) {
    %c0_i32 = arith.constant 0 : i32
    %c0_i32_0 = arith.constant 0 : i32
    %c0_i32_1 = arith.constant 0 : i32
    return %c0_i32, %c0_i32_0 : i32, i32
  }
  func.func @transform_7(%arg0: i32) -> (i32, i32) {
    %c0_i32 = arith.constant 0 : i32
    %c0_i32_0 = arith.constant 0 : i32
    return %arg0, %c0_i32 : i32, i32
  }
}

</mosaic_0001>

<bundles_post_ra>
// kernel: dqn_forward.1
= control target key start
LH: loop header
LB: loop body
LE: loop exit
PB: predicated region body
PF: predicated region fallthrough
CT: control target
= control target key end

     0   :  { %vm35_vm0 = vcmask 64512   ;;  %v419_v0 = vmov 0.0   ;;  %vm420_vm1 = vmmov 0   ;;  %s614_s1 = inlined_call_operand.vmem [shape: f32[8,128], index: 1, kind: input, shape index: {}]   ;;  %s615_s0 = inlined_call_operand.vmem [shape: f32[8,8], index: 0, kind: input, shape index: {}]   ;;  %s616_s3 = inlined_call_operand.vmem [shape: f32[128,128], index: 3, kind: input, shape index: {}]   ;;  %s617_s5 = inlined_call_operand.vmem [shape: f32[128,128], index: 5, kind: input, shape index: {}]   ;;  %s618_s2 = inlined_call_operand.vmem [shape: f32[1,128], index: 2, kind: input, shape index: {}]   ;;  %s619_s4 = inlined_call_operand.vmem [shape: f32[1,128], index: 4, kind: input, shape index: {}]   ;;  %s620_s6 = inlined_call_operand.vmem [shape: f32[1,128], index: 6, kind: input, shape index: {}]   ;;  %s621_s7 = inlined_call_operand.vmem [shape: f32[8,128], index: 7, kind: output, shape index: {}]  }
   0x1   :  { %342 = vmatprep.subr.mxu0 %v419_v0  ;;  %v27_v1 = vld [vmem:[%s614_s1] sm:$0xff]  ;;  %344 = vmatprep.mubr.msk.f32.mxu0 %vm420_vm1, %v419_v0  ;;  %v125_v3 = vld [vmem:[%s616_s3 + $0x78] sm:$0xff]  ;;  %v124_v4 = vld [vmem:[%s616_s3 + $0x70] sm:$0xff] }
   0x2   :  { %v26_v2 = vld [vmem:[%s615_s0] sm:$0xff]  ;;  %343 = vmatpush3.msra.mxu0 %v27_v1  ;;  %347 = vmatprep.subr.mxu1 %v419_v0  ;;  %v123_v5 = vld [vmem:[%s616_s3 + $0x68] sm:$0xff]  ;;  %v121_v7 = vld [vmem:[%s616_s3 + $0x58] sm:$0xff] }
   0x3   :  { %345 = vmatmul.mubr.msk.f32.vlgmr.msra.gmra.mxu0 %vm35_vm0, %v26_v2  ;;  %348 = vmatpush3.msra.mxu1 %v125_v3  ;;  %v122_v6 = vld [vmem:[%s616_s3 + $0x60] sm:$0xff]  ;;  %v120_v8 = vld [vmem:[%s616_s3 + $0x50] sm:$0xff]  ;;  %v119_v9 = vld [vmem:[%s616_s3 + $0x48] sm:$0xff] }
   0x4   :  { %349 = vmatprep.subr.mxu1 %v419_v0  ;;  %379 = vmatprep.mubr.msk.f32.mxu1 %vm420_vm1, %v419_v0  ;;  %v118_v10 = vld [vmem:[%s616_s3 + $0x40] sm:$0xff]  ;;  %v117_v11 = vld [vmem:[%s616_s3 + $0x38] sm:$0xff]  ;;  %v116_v12 = vld [vmem:[%s616_s3 + $0x30] sm:$0xff] }
   0x5   :  { %350 = vmatpush3.msra.mxu1 %v124_v4  ;;  %382 = vmatprep.subr.mxu0 %v419_v0  ;;  %v115_v13 = vld [vmem:[%s616_s3 + $0x28] sm:$0xff]  ;;  %v114_v14 = vld [vmem:[%s616_s3 + $0x20] sm:$0xff]  ;;  %v113_v15 = vld [vmem:[%s616_s3 + $0x18] sm:$0xff] }
   0x6   :  { %351 = vmatprep.subr.mxu1 %v419_v0  ;;  %414 = vmatprep.mubr.msk.f32.mxu0 %vm420_vm1, %v419_v0  ;;  %v112_v16 = vld [vmem:[%s616_s3 + $0x10] sm:$0xff]  ;;  %v111_v17 = vld [vmem:[%s616_s3 + $0x8] sm:$0xff]  ;;  %v110_v18 = vld [vmem:[%s616_s3] sm:$0xff] }
   0x7   :  { %352 = vmatpush3.msra.mxu1 %v123_v5  ;;  %v219_v19 = vld [vmem:[%s617_s5 + $0x78] sm:$0xff]  ;;  %v218_v20 = vld [vmem:[%s617_s5 + $0x70] sm:$0xff]  ;;  %v217_v21 = vld [vmem:[%s617_s5 + $0x68] sm:$0xff] }
   0x8   :  { %353 = vmatprep.subr.mxu1 %v419_v0  ;;  %383 = vmatpush3.msra.mxu0 %v219_v19  ;;  %v216_v22 = vld [vmem:[%s617_s5 + $0x60] sm:$0xff]  ;;  %v215_v23 = vld [vmem:[%s617_s5 + $0x58] sm:$0xff]  ;;  %v214_v24 = vld [vmem:[%s617_s5 + $0x50] sm:$0xff] }
   0x9   :  { %354 = vmatpush3.msra.mxu1 %v122_v6  ;;  %384 = vmatprep.subr.mxu0 %v419_v0  ;;  %v213_v25 = vld [vmem:[%s617_s5 + $0x48] sm:$0xff]  ;;  %v212_v26 = vld [vmem:[%s617_s5 + $0x40] sm:$0xff]  ;;  %v211_v27 = vld [vmem:[%s617_s5 + $0x38] sm:$0xff] }
   0xa   :  { %355 = vmatprep.subr.mxu1 %v419_v0  ;;  %385 = vmatpush3.msra.mxu0 %v218_v20  ;;  %v210_v28 = vld [vmem:[%s617_s5 + $0x30] sm:$0xff]  ;;  %v209_v29 = vld [vmem:[%s617_s5 + $0x28] sm:$0xff]  ;;  %v208_v30 = vld [vmem:[%s617_s5 + $0x20] sm:$0xff] }
   0xb   :  { %356 = vmatpush3.msra.mxu1 %v121_v7  ;;  %386 = vmatprep.subr.mxu0 %v419_v0  ;;  %v207_v31 = vld [vmem:[%s617_s5 + $0x18] sm:$0xff]  ;;  %v302_v32 = vld [vmem:[%s618_s2] ss:$0 sm:$0xff]  ;;  %v206_v37 = vld [vmem:[%s617_s5 + $0x10] sm:$0xff] }
   0xc   :  { %357 = vmatprep.subr.mxu1 %v419_v0  ;;  %387 = vmatpush3.msra.mxu0 %v217_v21  ;;  %v205_v38 = vld [vmem:[%s617_s5 + $0x8] sm:$0xff]  ;;  %v204_v39 = vld [vmem:[%s617_s5] sm:$0xff] }
   0xd   :  { %358 = vmatpush3.msra.mxu1 %v120_v8  ;;  %388 = vmatprep.subr.mxu0 %v419_v0  ;;  %v304_v40 = vld [vmem:[%s619_s4] ss:$0 sm:$0xff] }
   0xe   :  { %359 = vmatprep.subr.mxu1 %v419_v0  ;;  %389 = vmatpush3.msra.mxu0 %v216_v22  ;;  %v305_v45 = vld [vmem:[%s620_s6] ss:$0 sm:$0xff] }
   0xf   :  { %360 = vmatpush3.msra.mxu1 %v119_v9  ;;  %390 = vmatprep.subr.mxu0 %v419_v0 }
  0x10   :  { %361 = vmatprep.subr.mxu1 %v419_v0  ;;  %391 = vmatpush3.msra.mxu0 %v215_v23 }
  0x11   :  { %362 = vmatpush3.msra.mxu1 %v118_v10  ;;  %392 = vmatprep.subr.mxu0 %v419_v0 }
  0x12   :  { %363 = vmatprep.subr.mxu1 %v419_v0  ;;  %393 = vmatpush3.msra.mxu0 %v214_v24 }
  0x13   :  { %364 = vmatpush3.msra.mxu1 %v117_v11  ;;  %394 = vmatprep.subr.mxu0 %v419_v0 }
  0x14   :  { %365 = vmatprep.subr.mxu1 %v419_v0  ;;  %395 = vmatpush3.msra.mxu0 %v213_v25 }
  0x15   :  { %366 = vmatpush3.msra.mxu1 %v116_v12  ;;  %396 = vmatprep.subr.mxu0 %v419_v0 }
  0x16   :  { %367 = vmatprep.subr.mxu1 %v419_v0  ;;  %397 = vmatpush3.msra.mxu0 %v212_v26 }
  0x17   :  { %368 = vmatpush3.msra.mxu1 %v115_v13  ;;  %398 = vmatprep.subr.mxu0 %v419_v0 }
  0x18   :  { %369 = vmatprep.subr.mxu1 %v419_v0  ;;  %399 = vmatpush3.msra.mxu0 %v211_v27 }
  0x19   :  { %370 = vmatpush3.msra.mxu1 %v114_v14  ;;  %400 = vmatprep.subr.mxu0 %v419_v0 }
  0x1a   :  { %371 = vmatprep.subr.mxu1 %v419_v0  ;;  %401 = vmatpush3.msra.mxu0 %v210_v28 }
  0x1b   :  { %372 = vmatpush3.msra.mxu1 %v113_v15  ;;  %402 = vmatprep.subr.mxu0 %v419_v0 }
  0x1c   :  { %373 = vmatprep.subr.mxu1 %v419_v0  ;;  %403 = vmatpush3.msra.mxu0 %v209_v29 }
  0x1d   :  { %374 = vmatpush3.msra.mxu1 %v112_v16  ;;  %404 = vmatprep.subr.mxu0 %v419_v0 }
  0x1e   :  { %375 = vmatprep.subr.mxu1 %v419_v0  ;;  %405 = vmatpush3.msra.mxu0 %v208_v30 }
  0x1f   :  { %376 = vmatpush3.msra.mxu1 %v111_v17  ;;  %406 = vmatprep.subr.mxu0 %v419_v0 }
  0x20   :  { %377 = vmatprep.subr.mxu1 %v419_v0  ;;  %407 = vmatpush3.msra.mxu0 %v207_v31 }
  0x21   :  { %378 = vmatpush3.msra.mxu1 %v110_v18  ;;  %408 = vmatprep.subr.mxu0 %v419_v0 }
  0x22   :  { %409 = vmatpush3.msra.mxu0 %v206_v37 }
  0x23   :  { %410 = vmatprep.subr.mxu0 %v419_v0 }
  0x24   :  { %411 = vmatpush3.msra.mxu0 %v205_v38 }
  0x25   :  { %412 = vmatprep.subr.mxu0 %v419_v0 }
  0x26   :  { %413 = vmatpush3.msra.mxu0 %v204_v39 }
  0xc3   :  { %v105_v33 = vpop.f32.mrf.mxu0 }
  0xc4   :  { %v106_v34 = vadd.f32 %v302_v32, %v105_v33 }
  0xc5   :  { %v346_v35 = vpop.f32.mrf.mxu0 }
  0xc6   :  { %v109_v36 = vmax.f32 %v106_v34, 0.0 }
  0xc8   :  { %380 = vmatmul.mubr.f32.vlgmr.msra.gmra.mxu1 %v109_v36 }
 0x188   :  { %v199_v41 = vpop.f32.mrf.mxu1 }
 0x189   :  { %v200_v42 = vadd.f32 %v304_v40, %v199_v41 }
 0x18a   :  { %v381_v43 = vpop.f32.mrf.mxu1 }
 0x18b   :  { %v203_v44 = vmax.f32 %v200_v42, 0.0 }
 0x18d   :  { %415 = vmatmul.mubr.f32.vlgmr.msra.gmra.mxu0 %v203_v44 }
 0x24d   :  { %v293_v46 = vpop.f32.mrf.mxu0 }
 0x24e   :  { %v294_v47 = vadd.f32 %v305_v45, %v293_v46 }
 0x24f   :  { %v416_v48 = vpop.f32.mrf.mxu0 }
 0x250   :  { %297 = vst [vmem:[%s621_s7] sm:$0xff] %v294_v47 }

</bundles_post_ra>
